<compile_context>
chip_gen: v7x
topology: tpu7x:2x2x1
jax: 0.10.0
libtpu: 0.0.40
codegen_flags: <defaults>
</compile_context>

<pallas_src>
import jax
import jax.numpy as jnp
from jax import lax
from jax.experimental import pallas as pl
from jax.experimental.pallas import tpu as pltpu


# ---------------------------------------------------------------------------
# Kernels
# ---------------------------------------------------------------------------
def _vpu_conv_bn_kernel(x_ref, w_ref, b_ref, o_ref):
    """Tiny-channel path: unrolled VPU multiply-accumulate (no MXU).

    x_ref: (nb, C_in, tw)   spatial on lanes (lane-dense)
    w_ref: (C_out, C_in)    1x1 conv weight with BN scale pre-folded
    b_ref: (C_out, 1)       folded BN bias = beta - running_mean * scale
    o_ref: (nb, C_out, tw)
    """
    nb, c_in, tw = x_ref.shape
    x = x_ref[...]
    w = w_ref[...]
    b = b_ref[...]
    # y = sum_k w[:, k] * x[:, k, :] + b  -- pure VPU broadcast-MACs that sit
    # in otherwise-idle VALU slots under the DMA.
    y = x[:, 0:1, :] * w[None, :, 0:1] + b[None, :, :]
    for k in range(1, c_in):
        y = y + x[:, k:k + 1, :] * w[None, :, k:k + 1]
    o_ref[...] = y.astype(o_ref.dtype)        # activation='Linear': no act.


def _mxu_conv_bn_kernel(x_ref, w_ref, b_ref, o_ref):
    """Larger-channel path: per-image MXU matmul at default precision."""
    w = w_ref[...]
    b = b_ref[...]
    for i in range(x_ref.shape[0]):           # nb is static and small (<= 8)
        y = jnp.dot(w, x_ref[i], preferred_element_type=jnp.float32)
        o_ref[i] = (y + b).astype(o_ref.dtype)


# ---------------------------------------------------------------------------
# Tiling policy
# ---------------------------------------------------------------------------
def _vmem_capacity_bytes():
    try:
        cap = getattr(pltpu.get_tpu_info(), "vmem_capacity_bytes", None)
        if cap:
            return int(min(max(int(cap), 32 << 20), 128 << 20))
    except Exception:
        pass
    return 64 << 20        # conservative fallback == v7x (smallest VMEM)


def _choose_tiling(n, c_in, c_out, hw, capacity, nb_limit):
    """Pick (nb images, tw lanes) per grid step.

    Targets ~1-4 MiB combined in+out blocks, prefers tw == hw (one contiguous
    HBM span per DMA) when it fits the per-generation budget, and batches
    images per step when single-image blocks would be tiny.
    """
    bpl = 4 * (c_in + c_out)                  # in+out bytes per spatial column
    target = min(4 << 20, capacity // 16)     # per-step combined block target
    max_block = capacity // 8                 # hard per-block ceiling
    per_image = bpl * hw

    def _largest_batch(cap_imgs):
        cap_imgs = max(1, min(cap_imgs, nb_limit))
        nb = 1
        for d in range(1, n + 1):             # largest divisor of n <= cap
            if n % d == 0 and d <= cap_imgs:
                nb = d
        return nb

    lane_dense = (hw % 128 == 0)
    if (not lane_dense) or per_image <= target:
        # Small images (or non-128 spatial extent, where the block's last dim
        # must equal the full array dim): full hw per step, batch images.
        return _largest_batch(target // max(per_image, 1)), hw

    # Large images: one image per step.
    if per_image <= max_block and n >= 8:
        # Full-hw contiguous DMA fits the budget and the batch axis alone
        # gives enough grid steps for pipelining / both v7x TensorCores.
        return 1, hw
    # Otherwise split the spatial axis into lane-dense chunks near `target`.
    tw = min(hw, max(128, (target // bpl) // 128 * 128))
    while hw % tw:                            # need a 128-multiple divisor
        tw -= 128
    return 1, max(tw, 128)


# ---------------------------------------------------------------------------
# Wrapper
# ---------------------------------------------------------------------------
def conv_linear_block(x_nchw, w_oihw, gamma, beta, running_mean, running_var,
                      eps=1e-5):
    """ConvLinearBlock forward (kernel=1, stride=1, pad=0, groups=1, no conv
    bias, BatchNorm eval statistics, activation='Linear')."""
    n, c_in, h, w_sp = x_nchw.shape
    c_out, c_in_w, kh, kw = w_oihw.shape
    assert (kh, kw) == (1, 1), "only kernel_size=1 is supported"
    assert c_in_w == c_in, "groups != 1 is not supported"
    hw = h * w_sp

    # Fold BN (eval semantics) into the tiny conv weight -- free in wrapper.
    scale = gamma / jnp.sqrt(running_var + eps)                      # (C_out,)
    w_folded = (w_oihw.reshape(c_out, c_in) * scale[:, None]).astype(jnp.float32)
    bias = (beta - running_mean * scale).reshape(c_out, 1).astype(jnp.float32)

    # Free reshape on contiguous NCHW; no transpose, no extra HBM pass.
    x_flat = x_nchw.reshape(n, c_in, hw)

    capacity = _vmem_capacity_bytes()
    bpl = 4 * (c_in + c_out)

    # Lane-density handling: if hw is not a multiple of 128 and a full-image
    # block would blow the VMEM budget, pad hw once (one extra HBM pass, but
    # it restores lane-dense tiling and avoids a v7x VMEM overflow);
    # otherwise keep hw as-is (a block whose last dim equals the full array
    # dim is always legal).
    hw_work, x_work = hw, x_flat
    pad = (-hw) % 128
    if pad and bpl * hw > capacity // 8:
        # TODO(synk): a 4-D (H-chunk, W) tiling would avoid this extra pass
        # when W itself is a multiple of 128.
        x_work = jnp.pad(x_flat, ((0, 0), (0, 0), (0, pad)))
        hw_work = hw + pad

    # Tiny channel counts -> VPU MAC path; otherwise MXU (default precision).
    use_vpu = (c_in <= 16 and c_out <= 16)
    kernel = _vpu_conv_bn_kernel if use_vpu else _mxu_conv_bn_kernel
    nb_limit = n if use_vpu else 8            # MXU path unrolls over nb

    nb, tw = _choose_tiling(n, c_in, c_out, hw_work, capacity, nb_limit)
    grid = (n // nb, hw_work // tw)

    # Explicit VMEM budget: double-buffered in/out blocks + kernel temporaries
    # + the tiny weight/bias, clamped well inside the per-generation capacity.
    block_bytes = 4 * nb * tw * (c_in + c_out) + 4 * (c_out * c_in + c_out)
    vmem_bytes = int(min(max(6 * block_bytes, 8 << 20), (capacity * 3) // 4))

    out_flat = pl.pallas_call(
        kernel,
        out_shape=jax.ShapeDtypeStruct((n, c_out, hw_work), x_nchw.dtype),
        grid_spec=pltpu.PrefetchScalarGridSpec(
            num_scalar_prefetch=0,
            grid=grid,
            in_specs=[
                pl.BlockSpec((nb, c_in, tw), lambda i, j: (i, 0, j)),
                pl.BlockSpec((c_out, c_in), lambda i, j: (0, 0)),
                pl.BlockSpec((c_out, 1), lambda i, j: (0, 0)),
            ],
            out_specs=pl.BlockSpec((nb, c_out, tw), lambda i, j: (i, 0, j)),
        ),
        compiler_params=pltpu.CompilerParams(
            dimension_semantics=("parallel", "parallel"),
            vmem_limit_bytes=vmem_bytes,
        ),
    )(x_work, w_folded, bias)

    if hw_work != hw:
        out_flat = out_flat[:, :, :hw]
    return out_flat.reshape(n, c_out, h, w_sp)


# ---------------------------------------------------------------------------
# Reference + self-test
# ---------------------------------------------------------------------------
def _reference(x_nchw, w_oihw, gamma, beta, running_mean, running_var,
               eps=1e-5):
    c_out = w_oihw.shape[0]
    y = lax.conv_general_dilated(
        x_nchw, w_oihw, window_strides=(1, 1), padding=((0, 0), (0, 0)),
        dimension_numbers=("NCHW", "OIHW", "NCHW"),
        precision=lax.Precision.HIGHEST)
    s = (gamma / jnp.sqrt(running_var + eps)).reshape(1, c_out, 1, 1)
    b = (beta - running_mean * gamma / jnp.sqrt(running_var + eps)).reshape(
        1, c_out, 1, 1)
    return y * s + b          # activation='Linear' -> no ReLU


if __name__ == "__main__":
    key = jax.random.PRNGKey(0)
    k_x, k_w, k_g, k_b, k_m, k_v = jax.random.split(key, 6)

    N, C_in, C_out, H, W = 2, 4, 8, 16, 16
    x = jax.random.normal(k_x, (N, C_in, H, W), dtype=jnp.float32)

    # Conv2d weight: PyTorch shape (out_c, in_c/groups=in_c, 1, 1), no bias.
    w = jax.random.normal(k_w, (C_out, C_in, 1, 1), dtype=jnp.float32) * 0.3
    # BatchNorm2d parameters / running stats (deterministic, eval semantics).
    gamma = 1.0 + 0.1 * jax.random.normal(k_g, (C_out,), dtype=jnp.float32)
    beta = 0.1 * jax.random.normal(k_b, (C_out,), dtype=jnp.float32)
    running_mean = 0.05 * jax.random.normal(k_m, (C_out,), dtype=jnp.float32)
    running_var = 1.0 + 0.1 * jax.random.uniform(k_v, (C_out,), dtype=jnp.float32)

    out = conv_linear_block(x, w, gamma, beta, running_mean, running_var)
    out = jax.block_until_ready(out)

    ref = _reference(x, w, gamma, beta, running_mean, running_var)
    assert out.shape == (N, C_out, H, W)
    # VPU path is exact f32 MAC; tolerance also covers the MXU path at
    # default precision for larger channel counts.
    assert jnp.allclose(out, ref, atol=5e-3, rtol=5e-3), "mismatch vs reference"

    print("KERNEL_OK")
</pallas_src>

<mosaic_0001>
module attributes {stable_mosaic.version = 11 : i64} {
  func.func @_vpu_conv_bn_kernel(%arg0: i32, %arg1: i32, %arg2: memref<2x4x256xf32, #tpu.memory_space<vmem>>, %arg3: memref<8x4xf32, #tpu.memory_space<vmem>>, %arg4: memref<8x1xf32, #tpu.memory_space<vmem>>, %arg5: memref<2x8x256xf32, #tpu.memory_space<vmem>>) attributes {dimension_semantics = [#tpu.dimension_semantics<parallel>, #tpu.dimension_semantics<parallel>], iteration_bounds = array<i64: 1, 1>, scalar_prefetch = 0 : i64, scratch_operands = 0 : i64, tpu.core_type = #tpu.core_type<tc>, window_params = [{transform_indices = @transform_0, window_bounds = array<i64: 2, 4, 256>}, {pipeline_mode = #tpu.pipeline_mode<synchronous>, transform_indices = @transform_1, window_bounds = array<i64: 8, 4>}, {pipeline_mode = #tpu.pipeline_mode<synchronous>, transform_indices = @transform_2, window_bounds = array<i64: 8, 1>}, {transform_indices = @transform_3, window_bounds = array<i64: 2, 8, 256>}]} {
    %c0 = arith.constant 0 : index
    %c0_0 = arith.constant 0 : index
    %c0_1 = arith.constant 0 : index
    %0 = vector.load %arg2[%c0, %c0_0, %c0_1] : memref<2x4x256xf32, #tpu.memory_space<vmem>>, vector<2x4x256xf32>
    %c0_2 = arith.constant 0 : index
    %c0_3 = arith.constant 0 : index
    %1 = vector.load %arg3[%c0_2, %c0_3] : memref<8x4xf32, #tpu.memory_space<vmem>>, vector<8x4xf32>
    %c0_4 = arith.constant 0 : index
    %c0_5 = arith.constant 0 : index
    %2 = vector.load %arg4[%c0_4, %c0_5] : memref<8x1xf32, #tpu.memory_space<vmem>>, vector<8x1xf32>
    %3 = vector.extract_strided_slice %0 {offsets = [0, 0, 0], sizes = [2, 1, 256], strides = [1, 1, 1]} : vector<2x4x256xf32> to vector<2x1x256xf32>
    %4 = vector.extract_strided_slice %1 {offsets = [0, 0], sizes = [8, 1], strides = [1, 1]} : vector<8x4xf32> to vector<8x1xf32>
    %5 = vector.shape_cast %4 : vector<8x1xf32> to vector<1x8x1xf32>
    %6 = vector.broadcast %3 : vector<2x1x256xf32> to vector<2x8x256xf32>
    %7 = vector.broadcast %5 : vector<1x8x1xf32> to vector<2x8x256xf32>
    %8 = arith.mulf %6, %7 : vector<2x8x256xf32>
    %9 = vector.shape_cast %2 : vector<8x1xf32> to vector<1x8x1xf32>
    %10 = vector.broadcast %9 : vector<1x8x1xf32> to vector<2x8x256xf32>
    %11 = arith.addf %8, %10 : vector<2x8x256xf32>
    %12 = vector.extract_strided_slice %0 {offsets = [0, 1, 0], sizes = [2, 1, 256], strides = [1, 1, 1]} : vector<2x4x256xf32> to vector<2x1x256xf32>
    %13 = vector.extract_strided_slice %1 {offsets = [0, 1], sizes = [8, 1], strides = [1, 1]} : vector<8x4xf32> to vector<8x1xf32>
    %14 = vector.shape_cast %13 : vector<8x1xf32> to vector<1x8x1xf32>
    %15 = vector.broadcast %12 : vector<2x1x256xf32> to vector<2x8x256xf32>
    %16 = vector.broadcast %14 : vector<1x8x1xf32> to vector<2x8x256xf32>
    %17 = arith.mulf %15, %16 : vector<2x8x256xf32>
    %18 = arith.addf %11, %17 : vector<2x8x256xf32>
    %19 = vector.extract_strided_slice %0 {offsets = [0, 2, 0], sizes = [2, 1, 256], strides = [1, 1, 1]} : vector<2x4x256xf32> to vector<2x1x256xf32>
    %20 = vector.extract_strided_slice %1 {offsets = [0, 2], sizes = [8, 1], strides = [1, 1]} : vector<8x4xf32> to vector<8x1xf32>
    %21 = vector.shape_cast %20 : vector<8x1xf32> to vector<1x8x1xf32>
    %22 = vector.broadcast %19 : vector<2x1x256xf32> to vector<2x8x256xf32>
    %23 = vector.broadcast %21 : vector<1x8x1xf32> to vector<2x8x256xf32>
    %24 = arith.mulf %22, %23 : vector<2x8x256xf32>
    %25 = arith.addf %18, %24 : vector<2x8x256xf32>
    %26 = vector.extract_strided_slice %0 {offsets = [0, 3, 0], sizes = [2, 1, 256], strides = [1, 1, 1]} : vector<2x4x256xf32> to vector<2x1x256xf32>
    %27 = vector.extract_strided_slice %1 {offsets = [0, 3], sizes = [8, 1], strides = [1, 1]} : vector<8x4xf32> to vector<8x1xf32>
    %28 = vector.shape_cast %27 : vector<8x1xf32> to vector<1x8x1xf32>
    %29 = vector.broadcast %26 : vector<2x1x256xf32> to vector<2x8x256xf32>
    %30 = vector.broadcast %28 : vector<1x8x1xf32> to vector<2x8x256xf32>
    %31 = arith.mulf %29, %30 : vector<2x8x256xf32>
    %32 = arith.addf %25, %31 : vector<2x8x256xf32>
    %c0_6 = arith.constant 0 : index
    %c0_7 = arith.constant 0 : index
    %c0_8 = arith.constant 0 : index
    %33 = vector.load %arg5[%c0_6, %c0_7, %c0_8] : memref<2x8x256xf32, #tpu.memory_space<vmem>>, vector<2x8x256xf32>
    tpu.vector_store %arg5[%c0_6, %c0_7, %c0_8], %32 {strides = array<i32>} : memref<2x8x256xf32, #tpu.memory_space<vmem>>, vector<2x8x256xf32>,
    return
  }
  func.func @transform_0(%arg0: i32, %arg1: i32) -> (i32, i32, i32) {
    %c0_i32 = arith.constant 0 : i32
    %c0_i32_0 = arith.constant 0 : i32
    return %arg0, %c0_i32, %arg1 : i32, i32, i32
  }
  func.func @transform_1(%arg0: i32, %arg1: i32) -> (i32, i32) {
    %c0_i32 = arith.constant 0 : i32
    %c0_i32_0 = arith.constant 0 : i32
    %c0_i32_1 = arith.constant 0 : i32
    return %c0_i32, %c0_i32_0 : i32, i32
  }
  func.func @transform_2(%arg0: i32, %arg1: i32) -> (i32, i32) {
    %c0_i32 = arith.constant 0 : i32
    %c0_i32_0 = arith.constant 0 : i32
    %c0_i32_1 = arith.constant 0 : i32
    return %c0_i32, %c0_i32_0 : i32, i32
  }
  func.func @transform_3(%arg0: i32, %arg1: i32) -> (i32, i32, i32) {
    %c0_i32 = arith.constant 0 : i32
    %c0_i32_0 = arith.constant 0 : i32
    return %arg0, %c0_i32, %arg1 : i32, i32, i32
  }
}

</mosaic_0001>

<bundles_post_ra>
// kernel: tpu_custom_call.1
= control target key start
LH: loop header
LB: loop body
LE: loop exit
PB: predicated region body
PF: predicated region fallthrough
CT: control target
= control target key end

     0   :  { %v274_v1 = vmov 0   ;;  %v275_v2 = vmov 1   ;;  %s333_s0 = inlined_call_operand.vmem [shape: f32[2,4,256], index: 0, kind: input, shape index: {}]   ;;  %s334_s1 = inlined_call_operand.vmem [shape: f32[8,4], index: 1, kind: input, shape index: {}]   ;;  %s335_s2 = inlined_call_operand.vmem [shape: f32[8,1], index: 2, kind: input, shape index: {}]   ;;  %s336_s3 = inlined_call_operand.hbm [shape: f32[2,8,256], index: 3, kind: output, shape index: {}]  }
   0x1   :  { %v17_v0 = vld [vmem:[%s334_s1] sm:$0xff]  ;;  %246 = vset.pattern.permute.xlu0 %v274_v1  ;;  %247 = vset.pattern.permute.xlu1 %v275_v2 }
   0x2   :  { %8 = vsyncpa [#allocation3], 0  ;;  %59 = vperm.xlu0 %246, %v17_v0   ;;  %112 = vperm.xlu1 %247, %v17_v0   ;;  %v18_v3 = vld [vmem:[%s335_s2] sm:$0xff]  ;;  %v276_v4 = vmov 2   ;;  %v277_v5 = vmov 3   ;;  %v21_v6 = vlaneseq  ;;  %v16_v11 = vld [vmem:[%s333_s0 + $0x8] sm:$0xff] }
   0x3   :  { %v15_v10 = vld [vmem:[%s333_s0] sm:$0xff]  ;;  %s278_s0 = smov [#allocation2]  }
   0x4   :  { %v22_v7 = vshrl.u32 %v21_v6, 7  ;;  %s228_s2 = sshll.u32 %s278_s0, 4  ;;  %s229_s2 = int_to_ptr.vmem [resolvable:$true] %s228_s2 }
   0x5   :  { %s250_s19 = scalar_lea.vmem %s229_s2, 512  ;;  %p255_p1 = scmp.lt.s32.totalorder %s229_s2, %s229_s2 }
   0x6   :  { %68 = vperm.xlu0 %246, %v18_v3   ;;  %248 = vset.pattern.permute.xlu1 %v276_v4  ;;  %v23_v8 = vsub.s32 0, %v22_v7  ;;  %v27_v9 = vsub.s32 4, %v22_v7  ;;  %v77_v12 = vsub.s32 1, %v22_v7  ;;  %v81_v13 = vsub.s32 5, %v22_v7  ;;  %p251_p0 = scmp.ne.s32.totalorder %s229_s2, %s250_s19  ;;  %p256_p2 = scmp.lt.s32.totalorder %s250_s19, %s250_s19 }
   0x7   :  { %160 = vperm.xlu1 %248, %v17_v0   ;;  %v125_v14 = vsub.s32 2, %v22_v7  ;;  %v129_v15 = vsub.s32 6, %v22_v7  ;;  %v313_v16 = vsub.s32 3, %v22_v7  ;;  %v177_v17 = vsub.s32 7, %v22_v7 }
   0x8   :  { %v24_v18 = vrot.slane %v15_v10, %v23_v8  ;;  %v28_v19 = vrot.slane %v15_v10, %v27_v9  ;;  %v32_v20 = vrot.slane %v16_v11, %v23_v8  ;;  %v36_v21 = vrot.slane %v16_v11, %v27_v9  ;;  %p257_p3 = por %p256_p2, %p255_p1 }
   0x9   :  { %v78_v22 = vrot.slane %v15_v10, %v77_v12  ;;  %v82_v23 = vrot.slane %v15_v10, %v81_v13  ;;  %v86_v24 = vrot.slane %v16_v11, %v77_v12  ;;  %v90_v25 = vrot.slane %v16_v11, %v81_v13 }
   0xa   :  { %249 = vset.pattern.permute.xlu0 %v277_v5  ;;  %v126_v26 = vrot.slane %v15_v10, %v125_v14  ;;  %v130_v27 = vrot.slane %v15_v10, %v129_v15  ;;  %v134_v28 = vrot.slane %v16_v11, %v125_v14  ;;  %v138_v29 = vrot.slane %v16_v11, %v129_v15  ;;  %p258_p4 = pnand %p257_p3, %p251_p0 }
   0xb   :  { %208 = vperm.xlu0 %249, %v17_v0   ;;  %v174_v30 = vrot.slane %v15_v10, %v313_v16  ;;  %v178_v31 = vrot.slane %v15_v10, %v177_v17  ;;  %v182_v32 = vrot.slane %v16_v11, %v313_v16  ;;  %v186_v33 = vrot.slane %v16_v11, %v177_v17 }
   0xc   :  { %v44_v34 = vrot.slane %v24_v18, %v23_v8  ;;  %v48_v35 = vrot.slane %v28_v19, %v23_v8  ;;  %v52_v36 = vrot.slane %v32_v20, %v23_v8  ;;  %v56_v37 = vrot.slane %v36_v21, %v23_v8 }
   0xd   :  { %v98_v40 = vrot.slane %v78_v22, %v77_v12  ;;  %v102_v41 = vrot.slane %v82_v23, %v77_v12  ;;  %v106_v42 = vrot.slane %v86_v24, %v77_v12  ;;  %v110_v43 = vrot.slane %v90_v25, %v77_v12 }
   0xe   :  { %v146_v44 = vrot.slane %v126_v26, %v125_v14  ;;  %v150_v45 = vrot.slane %v130_v27, %v125_v14  ;;  %v154_v46 = vrot.slane %v134_v28, %v125_v14  ;;  %v158_v47 = vrot.slane %v138_v29, %v125_v14 }
   0xf   :  { %v194_v48 = vrot.slane %v174_v30, %v313_v16  ;;  %v198_v49 = vrot.slane %v178_v31, %v313_v16  ;;  %v202_v50 = vrot.slane %v182_v32, %v313_v16  ;;  %v206_v51 = vrot.slane %v186_v33, %v313_v16 }
  0x81   :  { %v60_v38 = vpop.permute.xlu0 %59  ;;  %v113_v39 = vpop.permute.xlu1 %112 }
  0x82   :  { %v62_v52 = vmul.f32 %v60_v38, %v44_v34  ;;  %v63_v53 = vmul.f32 %v60_v38, %v48_v35  ;;  %v64_v54 = vmul.f32 %v60_v38, %v52_v36  ;;  %v65_v55 = vmul.f32 %v60_v38, %v56_v37 }
  0x83   :  { %v115_v56 = vmul.f32 %v113_v39, %v98_v40  ;;  %v116_v57 = vmul.f32 %v113_v39, %v102_v41  ;;  %v117_v58 = vmul.f32 %v113_v39, %v106_v42  ;;  %v118_v59 = vmul.f32 %v113_v39, %v110_v43 }
  0x85   :  { %v69_v60 = vpop.permute.xlu0 %68 }
  0x86   :  { %v71_v61 = vadd.f32 %v69_v60, %v62_v52  ;;  %v72_v62 = vadd.f32 %v69_v60, %v63_v53  ;;  %v73_v63 = vadd.f32 %v69_v60, %v64_v54  ;;  %v74_v0 = vadd.f32 %v69_v60, %v65_v55  ;;  %v161_v1 = vpop.permute.xlu1 %160 }
  0x87   :  { %v163_v2 = vmul.f32 %v161_v1, %v146_v44  ;;  %v164_v3 = vmul.f32 %v161_v1, %v150_v45  ;;  %v165_v4 = vmul.f32 %v161_v1, %v154_v46  ;;  %v166_v5 = vmul.f32 %v161_v1, %v158_v47 }
  0x88   :  { %v119_v6 = vadd.f32 %v115_v56, %v71_v61  ;;  %v120_v7 = vadd.f32 %v116_v57, %v72_v62  ;;  %v121_v8 = vadd.f32 %v117_v58, %v73_v63  ;;  %v122_v9 = vadd.f32 %v118_v59, %v74_v0 }
  0x8a   :  { %v167_v10 = vadd.f32 %v163_v2, %v119_v6  ;;  %v168_v11 = vadd.f32 %v164_v3, %v120_v7  ;;  %v169_v12 = vadd.f32 %v165_v4, %v121_v8  ;;  %v170_v13 = vadd.f32 %v166_v5, %v122_v9  ;;  %v209_v14 = vpop.permute.xlu0 %208 }
  0x8b   :  { %v211_v15 = vmul.f32 %v209_v14, %v194_v48  ;;  %v212_v16 = vmul.f32 %v209_v14, %v198_v49  ;;  %v213_v17 = vmul.f32 %v209_v14, %v202_v50  ;;  %v214_v18 = vmul.f32 %v209_v14, %v206_v51 }
  0x8d   :  { %v215_v19 = vadd.f32 %v211_v15, %v167_v10  ;;  %v216_v20 = vadd.f32 %v212_v16, %v168_v11  ;;  %v217_v21 = vadd.f32 %v213_v17, %v169_v12  ;;  %v218_v22 = vadd.f32 %v214_v18, %v170_v13 }
  0x8f   :  { %219 = vst [vmem:[#allocation2] sm:$0xff] %v215_v19  ;;  %220 = vst [vmem:[#allocation2 + $0x8] sm:$0xff] %v216_v20 }
  0x90   :  { %221 = vst [vmem:[#allocation2 + $0x10] sm:$0xff] %v217_v21  ;;  %222 = vst [vmem:[#allocation2 + $0x18] sm:$0xff] %v218_v22 }
  0x91   :  { %261 = shalt.err (!%p258_p4)
}
  0x92   :  { %s262_s22 = scalar_lea.hbm %s336_s3, 512 }
  0x93   :  { %p263_p5 = scmp.ne.s32.totalorder %s336_s3, %s262_s22  ;;  %p266_p6 = scmp.lt.u32.totalorder %s262_s22, %s336_s3 }
  0x95   :  { %p268_p7 = pnand %p266_p6, %p263_p5 }
  0x97   :  { %271 = shalt.err (!%p268_p7)
}
  0x98   :  { %s279_s27 = smov 256   ;;  %s280_s28 = smov 16  }
  0x99   :  { %234 = dma.vmem_to_hbm [thread:$0]  %s229_s2, 512, %s336_s3, [#allocation3], %s279_s27, %s279_s27, %s280_s28  }
  0x9a   :  { %272 = dma.done.wait [#allocation3], 512  }
  0x9b   :  { %273 = vsyncadd [#allocation3], 4294966784 }
  0x9c   :  { %238 = vsyncpa [#allocation3], 1 }

</bundles_post_ra>
